<compile_context>
chip_gen: v7x
topology: tpu7x:2x2x1
jax: 0.10.0
libtpu: 0.0.40
codegen_flags: <defaults>
</compile_context>

<pallas_src>
import functools

import jax
import jax.numpy as jnp
from jax.experimental import pallas as pl
from jax.experimental.pallas import tpu as pltpu

LANES = 128
TARGET_BLOCK_BYTES = 4 * 1024 * 1024   # per input, per pipeline buffer
VMEM_LIMIT_BYTES = 32 * 1024 * 1024    # 2 inputs x 2 buffers x 4 MiB + headroom


def _num_tensorcores():
    """Best-effort detection of multi-TensorCore chips (v4 / v5p / v7x)."""
    try:
        dev = jax.devices()[0]
        kind = (getattr(dev, "device_kind", "") or "").lower()
        if "v7" in kind or "v4" in kind or "v5p" in kind:
            return 2
    except Exception:
        pass
    return 1


def _charbonnier_kernel(eps2_ref, x_ref, y_ref, out_ref, acc_ref, *,
                        rows, block_rows, steps, need_mask):
    c = pl.program_id(0)   # parallel slice (one per TensorCore on megacore parts)
    i = pl.program_id(1)   # reduction step within the slice

    @pl.when(i == 0)
    def _():
        acc_ref[...] = jnp.zeros_like(acc_ref)

    eps2 = eps2_ref[0]
    d = x_ref[...].astype(jnp.float32) - y_ref[...].astype(jnp.float32)
    val = jnp.sqrt(d * d + eps2)

    def _accumulate(v):
        # Fold the (block_rows, 128) tile into the (8, 128) vector accumulator.
        acc_ref[...] += jnp.sum(v.reshape(block_rows // 8, 8, LANES), axis=0)

    if need_mask:
        # Only the single boundary block (the partial last block of the slab)
        # pays the iota/compare/select; interior blocks take the cheap branch.
        row_start = (c * steps + i) * block_rows
        is_boundary = row_start + block_rows > rows

        @pl.when(jnp.logical_not(is_boundary))
        def _():
            _accumulate(val)

        @pl.when(is_boundary)
        def _():
            row_ids = row_start + jax.lax.broadcasted_iota(
                jnp.int32, (block_rows, LANES), 0)
            _accumulate(jnp.where(row_ids < rows, val, 0.0))
    else:
        _accumulate(val)

    @pl.when(i == pl.num_programs(1) - 1)
    def _():
        out_ref[...] = acc_ref[...]


def _charbonnier_partial_sum(x2d, y2d, eps2_arr, num_slices, sublane_mult):
    """Sum of sqrt((x-y)^2 + eps^2) over a lane-dense (rows, 128) slab."""
    rows = x2d.shape[0]
    max_itemsize = max(jnp.dtype(x2d.dtype).itemsize,
                       jnp.dtype(y2d.dtype).itemsize)
    cap_rows = max(sublane_mult,
                   (TARGET_BLOCK_BYTES // (LANES * max_itemsize))
                   // sublane_mult * sublane_mult)

    if rows // num_slices < sublane_mult:
        num_slices = 1
    per_slice_rows = rows // num_slices
    block_rows = max(sublane_mult,
                     min(cap_rows,
                         (per_slice_rows // sublane_mult) * sublane_mult))

    total_blocks = pl.cdiv(rows, block_rows)
    if num_slices > 1 and total_blocks % num_slices != 0:
        # Fall back to one slice rather than issuing a clamped duplicate DMA
        # for an over-covered grid step.
        num_slices = 1
    steps = total_blocks // num_slices
    need_mask = (rows % block_rows) != 0     # only the final block is partial

    kernel = functools.partial(
        _charbonnier_kernel, rows=rows, block_rows=block_rows,
        steps=steps, need_mask=need_mask)

    n_main = rows * LANES
    cost = pl.CostEstimate(
        flops=3 * n_main,
        transcendentals=n_main,
        bytes_accessed=n_main * (jnp.dtype(x2d.dtype).itemsize
                                 + jnp.dtype(y2d.dtype).itemsize)
        + num_slices * 8 * LANES * 4)

    partials = pl.pallas_call(
        kernel,
        out_shape=jax.ShapeDtypeStruct((num_slices * 8, LANES), jnp.float32),
        grid_spec=pltpu.PrefetchScalarGridSpec(
            num_scalar_prefetch=0,
            grid=(num_slices, steps),
            in_specs=[
                pl.BlockSpec(memory_space=pltpu.MemorySpace.SMEM),   # eps^2
                pl.BlockSpec((block_rows, LANES), lambda c, i: (c * steps + i, 0)),
                pl.BlockSpec((block_rows, LANES), lambda c, i: (c * steps + i, 0)),
            ],
            out_specs=pl.BlockSpec((8, LANES), lambda c, i: (c, 0)),
            scratch_shapes=[pltpu.VMEM((8, LANES), jnp.float32)],
        ),
        compiler_params=pltpu.CompilerParams(
            dimension_semantics=("parallel", "arbitrary"),
            vmem_limit_bytes=VMEM_LIMIT_BYTES,
        ),
        cost_estimate=cost,
    )(eps2_arr, x2d, y2d)

    return jnp.sum(partials)


def charbonnier(output, gt, epsilon: float = 0.001):
    """Pallas TPU implementation of the Charbonnier loss (scalar f32)."""
    assert output.shape == gt.shape, "output / gt must have identical shapes"
    n = output.size
    if n == 0:
        # torch.mean over an empty tensor returns nan.
        return jnp.float32(float("nan"))

    eps2 = jnp.square(jnp.asarray(epsilon, jnp.float32))
    eps2_arr = eps2.reshape(1)

    flat_x = jnp.ravel(output)   # free for contiguous inputs (no HBM copy)
    flat_y = jnp.ravel(gt)

    rows = n // LANES
    min_itemsize = min(jnp.dtype(output.dtype).itemsize,
                       jnp.dtype(gt.dtype).itemsize)
    # Native sublane packing: 8 (f32) / 16 (bf16,f16) / 32 (int8,fp8) rows.
    sublane_mult = 32 // min(4, max(1, min_itemsize))
    use_kernel = rows >= sublane_mult
    n_main = rows * LANES if use_kernel else 0

    total = jnp.float32(0.0)
    if use_kernel:
        if n_main == n:
            x2d = flat_x.reshape(rows, LANES)
            y2d = flat_y.reshape(rows, LANES)
        else:
            x2d = flat_x[:n_main].reshape(rows, LANES)
            y2d = flat_y[:n_main].reshape(rows, LANES)
        total = total + _charbonnier_partial_sum(
            x2d, y2d, eps2_arr, _num_tensorcores(), sublane_mult)

    if n_main < n:
        # Ragged remainder (< 128 elements or tiny inputs): plain JAX.
        dt = (flat_x[n_main:].astype(jnp.float32)
              - flat_y[n_main:].astype(jnp.float32))
        total = total + jnp.sum(jnp.sqrt(dt * dt + eps2))

    return total / jnp.float32(n)


def _reference(output, gt, epsilon=0.001):
    d = output.astype(jnp.float32) - gt.astype(jnp.float32)
    return jnp.mean(jnp.sqrt(d * d + jnp.float32(epsilon) ** 2))


if __name__ == "__main__":
    key = jax.random.PRNGKey(0)
    k1, k2, k3, k4, k5, k6 = jax.random.split(key, 6)

    # NCHW-shaped example inputs (layout irrelevant for this elementwise loss).
    shape = (2, 4, 16, 16)
    output = jax.random.normal(k1, shape, dtype=jnp.float32)
    gt = jax.random.normal(k2, shape, dtype=jnp.float32)
    loss = charbonnier(output, gt, epsilon=0.001)
    jax.block_until_ready(loss)
    ref = _reference(output, gt, epsilon=0.001)
    assert jnp.allclose(loss, ref, rtol=1e-5, atol=1e-6), (loss, ref)

    # Ragged path: partial last row block + <128-element lane tail.
    shape2 = (3, 5, 7, 11)
    o2 = jax.random.normal(k3, shape2, dtype=jnp.float32)
    g2 = jax.random.normal(k4, shape2, dtype=jnp.float32)
    loss2 = charbonnier(o2, g2, epsilon=0.001)
    jax.block_until_ready(loss2)
    ref2 = _reference(o2, g2, epsilon=0.001)
    assert jnp.allclose(loss2, ref2, rtol=1e-5, atol=1e-6), (loss2, ref2)

    # bf16 inputs exercise the dtype-aware (16, 128) tile path.
    shape3 = (2, 4, 32, 32)
    o3 = jax.random.normal(k5, shape3, dtype=jnp.float32).astype(jnp.bfloat16)
    g3 = jax.random.normal(k6, shape3, dtype=jnp.float32).astype(jnp.bfloat16)
    loss3 = charbonnier(o3, g3, epsilon=0.001)
    jax.block_until_ready(loss3)
    ref3 = _reference(o3, g3, epsilon=0.001)
    assert jnp.allclose(loss3, ref3, rtol=1e-4, atol=1e-5), (loss3, ref3)

    print("KERNEL_OK")
</pallas_src>

<mosaic_0001>
module attributes {stable_mosaic.version = 11 : i64} {
  func.func @_charbonnier_kernel(%arg0: i32, %arg1: i32, %arg2: memref<1xf32, #tpu.memory_space<smem>>, %arg3: memref<16x128xf32, #tpu.memory_space<vmem>>, %arg4: memref<16x128xf32, #tpu.memory_space<vmem>>, %arg5: memref<8x128xf32, #tpu.memory_space<vmem>>, %arg6: memref<8x128xf32, #tpu.memory_space<vmem>>) attributes {dimension_semantics = [#tpu.dimension_semantics<parallel>, #tpu.dimension_semantics<arbitrary>], iteration_bounds = array<i64: 1, 1>, scalar_prefetch = 0 : i64, scratch_operands = 1 : i64, tpu.core_type = #tpu.core_type<tc>, window_params = [{transform_indices = @transform_0, window_bounds = array<i64: 1>}, {transform_indices = @transform_1, window_bounds = array<i64: 16, 128>}, {transform_indices = @transform_2, window_bounds = array<i64: 16, 128>}, {transform_indices = @transform_3, window_bounds = array<i64: 8, 128>}]} {
    %c0_i32 = arith.constant 0 : i32
    %0 = arith.cmpi eq, %arg1, %c0_i32 : i32
    %1 = arith.extui %0 : i1 to i32
    %c0_i32_0 = arith.constant 0 : i32
    %2 = arith.cmpi ne, %1, %c0_i32_0 : i32
    scf.if %2 {
      %cst_11 = arith.constant 0.000000e+00 : f32
      %19 = vector.broadcast %cst_11 : f32 to vector<8x128xf32>
      %c0_12 = arith.constant 0 : index
      %c0_13 = arith.constant 0 : index
      %20 = vector.load %arg6[%c0_12, %c0_13] : memref<8x128xf32, #tpu.memory_space<vmem>>, vector<8x128xf32>
      tpu.vector_store %arg6[%c0_12, %c0_13], %19 {strides = array<i32>} : memref<8x128xf32, #tpu.memory_space<vmem>>, vector<8x128xf32>,
    } else {
    }
    %c0 = arith.constant 0 : index
    %3 = memref.load %arg2[%c0] : memref<1xf32, #tpu.memory_space<smem>>
    %c0_1 = arith.constant 0 : index
    %c0_2 = arith.constant 0 : index
    %4 = vector.load %arg3[%c0_1, %c0_2] : memref<16x128xf32, #tpu.memory_space<vmem>>, vector<16x128xf32>
    %c0_3 = arith.constant 0 : index
    %c0_4 = arith.constant 0 : index
    %5 = vector.load %arg4[%c0_3, %c0_4] : memref<16x128xf32, #tpu.memory_space<vmem>>, vector<16x128xf32>
    %6 = arith.subf %4, %5 : vector<16x128xf32>
    %7 = arith.mulf %6, %6 : vector<16x128xf32>
    %8 = vector.broadcast %3 : f32 to vector<16x128xf32>
    %9 = arith.addf %7, %8 : vector<16x128xf32>
    %10 = math.sqrt %9 : vector<16x128xf32>
    %c0_5 = arith.constant 0 : index
    %c0_6 = arith.constant 0 : index
    %11 = vector.load %arg6[%c0_5, %c0_6] : memref<8x128xf32, #tpu.memory_space<vmem>>, vector<8x128xf32>
    %12 = vector.shape_cast %10 : vector<16x128xf32> to vector<2x8x128xf32>
    %cst = arith.constant dense<0.000000e+00> : vector<8x128xf32>
    %13 = vector.multi_reduction <add>, %12, %cst [0] : vector<2x8x128xf32> to vector<8x128xf32>
    %14 = arith.addf %11, %13 : vector<8x128xf32>
    %c0_7 = arith.constant 0 : index
    %c0_8 = arith.constant 0 : index
    %15 = vector.load %arg6[%c0_7, %c0_8] : memref<8x128xf32, #tpu.memory_space<vmem>>, vector<8x128xf32>
    tpu.vector_store %arg6[%c0_7, %c0_8], %14 {strides = array<i32>} : memref<8x128xf32, #tpu.memory_space<vmem>>, vector<8x128xf32>,
    %c0_i32_9 = arith.constant 0 : i32
    %16 = arith.cmpi eq, %arg1, %c0_i32_9 : i32
    %17 = arith.extui %16 : i1 to i32
    %c0_i32_10 = arith.constant 0 : i32
    %18 = arith.cmpi ne, %17, %c0_i32_10 : i32
    scf.if %18 {
      %c0_11 = arith.constant 0 : index
      %c0_12 = arith.constant 0 : index
      %19 = vector.load %arg6[%c0_11, %c0_12] : memref<8x128xf32, #tpu.memory_space<vmem>>, vector<8x128xf32>
      %c0_13 = arith.constant 0 : index
      %c0_14 = arith.constant 0 : index
      %20 = vector.load %arg5[%c0_13, %c0_14] : memref<8x128xf32, #tpu.memory_space<vmem>>, vector<8x128xf32>
      tpu.vector_store %arg5[%c0_13, %c0_14], %19 {strides = array<i32>} : memref<8x128xf32, #tpu.memory_space<vmem>>, vector<8x128xf32>,
    } else {
    }
    return
  }
  func.func @transform_0(%arg0: i32, %arg1: i32) -> i32 {
    %c0_i32 = arith.constant 0 : i32
    %c0_i32_0 = arith.constant 0 : i32
    return %c0_i32 : i32
  }
  func.func @transform_1(%arg0: i32, %arg1: i32) -> (i32, i32) {
    %c1_i32 = arith.constant 1 : i32
    %0 = arith.muli %arg0, %c1_i32 : i32
    %1 = arith.addi %0, %arg1 : i32
    %c0_i32 = arith.constant 0 : i32
    %c0_i32_0 = arith.constant 0 : i32
    return %1, %c0_i32 : i32, i32
  }
  func.func @transform_2(%arg0: i32, %arg1: i32) -> (i32, i32) {
    %c1_i32 = arith.constant 1 : i32
    %0 = arith.muli %arg0, %c1_i32 : i32
    %1 = arith.addi %0, %arg1 : i32
    %c0_i32 = arith.constant 0 : i32
    %c0_i32_0 = arith.constant 0 : i32
    return %1, %c0_i32 : i32, i32
  }
  func.func @transform_3(%arg0: i32, %arg1: i32) -> (i32, i32) {
    %c0_i32 = arith.constant 0 : i32
    %c0_i32_0 = arith.constant 0 : i32
    return %arg0, %c0_i32 : i32, i32
  }
}

</mosaic_0001>

<bundles_post_ra>
// kernel: tpu_custom_call.1
= control target key start
LH: loop header
LB: loop body
LE: loop exit
PB: predicated region body
PF: predicated region fallthrough
CT: control target
= control target key end

     0   :  { %9 = vsyncpa [#allocation5], 0  ;;  %s257_s0 = inlined_call_operand.<no memory space> [shape: f32[1], index: 0, kind: input, shape index: {}]   ;;  %s258_s1 = inlined_call_operand.hbm [shape: f32[16,128], index: 1, kind: input, shape index: {}]   ;;  %s259_s2 = inlined_call_operand.hbm [shape: f32[16,128], index: 2, kind: input, shape index: {}]   ;;  %s260_s3 = inlined_call_operand.hbm [shape: f32[8,128], index: 3, kind: output, shape index: {}]  }
   0x1   :  { %10 = vsyncpa [#allocation8], 0 }
   0x2   :  { %11 = vsyncpa [#allocation6], 0  ;;  %s193_s12 = smov [#allocation4]   ;;  %s121_s16 = scalar_lea.hbm %s258_s1, 256 }
   0x3   :  { %s23_s13 = sshll.u32 %s193_s12, 4  ;;  %p122_p0 = scmp.ne.s32.totalorder %s258_s1, %s121_s16  ;;  %s24_s13 = int_to_ptr.vmem [resolvable:$true] %s23_s13 }
   0x4   :  { %p125_p1 = scmp.lt.u32.totalorder %s121_s16, %s258_s1 }
   0x6   :  { %p127_p2 = pnand %p125_p1, %p122_p0 }
   0x8   :  { %130 = shalt.err (!%p127_p2)
}
   0x9   :  { %s131_s21 = scalar_lea.vmem %s24_s13, 256  ;;  %p136_p4 = scmp.lt.s32.totalorder %s24_s13, %s24_s13 }
   0xa   :  { %p132_p3 = scmp.ne.s32.totalorder %s24_s13, %s131_s21  ;;  %p137_p5 = scmp.lt.s32.totalorder %s131_s21, %s131_s21 }
   0xc   :  { %p138_p6 = por %p137_p5, %p136_p4 }
   0xe   :  { %p139_p7 = pnand %p138_p6, %p132_p3 }
  0x10   :  { %142 = shalt.err (!%p139_p7)
}
  0x11   :  { %s194_s22 = smov 128   ;;  %s195_s23 = smov 8  }
  0x12   :  { %29 = dma.hbm_to_vmem [thread:$0]  %s258_s1, 256, %s24_s13, [#allocation5], %s194_s22, %s194_s22, %s195_s23  }
  0x13   :  { %s196_s26 = smov [#allocation7]   ;;  %s143_s30 = scalar_lea.hbm %s259_s2, 256 }
  0x14   :  { %s39_s27 = sshll.u32 %s196_s26, 4  ;;  %p144_p8 = scmp.ne.s32.totalorder %s259_s2, %s143_s30  ;;  %s40_s27 = int_to_ptr.vmem [resolvable:$true] %s39_s27 }
  0x15   :  { %p147_p9 = scmp.lt.u32.totalorder %s143_s30, %s259_s2 }
  0x17   :  { %p149_p10 = pnand %p147_p9, %p144_p8 }
  0x19   :  { %152 = shalt.err (!%p149_p10)
}
  0x1a   :  { %s153_s8 = scalar_lea.vmem %s40_s27, 256  ;;  %p158_p12 = scmp.lt.s32.totalorder %s40_s27, %s40_s27 }
  0x1b   :  { %p154_p11 = scmp.ne.s32.totalorder %s40_s27, %s153_s8  ;;  %p159_p13 = scmp.lt.s32.totalorder %s153_s8, %s153_s8 }
  0x1d   :  { %p160_p0 = por %p159_p13, %p158_p12 }
  0x1f   :  { %p161_p1 = pnand %p160_p0, %p154_p11 }
  0x21   :  { %164 = shalt.err (!%p161_p1)
}
  0x22   :  { %45 = dma.hbm_to_vmem [thread:$0]  %s259_s2, 256, %s40_s27, [#allocation8], %s194_s22, %s194_s22, %s195_s23  }
  0x23   :  { %187 = dma.done.wait [#allocation5], 256  }
  0x24   :  { %188 = vsyncadd [#allocation5], 4294967040 }
  0x25   :  { %189 = dma.done.wait [#allocation8], 256  }
  0x26   :  { %190 = vsyncadd [#allocation8], 4294967040  ;;  %v62_v0 = vld [vmem:[#allocation4] sm:$0xff]  ;;  %v63_v1 = vld [vmem:[#allocation4 + $0x8] sm:$0xff]  ;;  %v70_v6 = vstv %s257_s0  ;;  %s197_s2 = smov [#allocation9]  }
  0x27   :  { %v64_v2 = vld [vmem:[#allocation7] sm:$0xff]  ;;  %v65_v3 = vld [vmem:[#allocation7 + $0x8] sm:$0xff]  ;;  %s102_s12 = sshll.u32 %s197_s2, 4  ;;  %s103_s12 = int_to_ptr.vmem [resolvable:$true] %s102_s12 }
  0x28   :  { %v66_v4 = vsub.f32 %v62_v0, %v64_v2  ;;  %v67_v5 = vsub.f32 %v63_v1, %v65_v3  ;;  %s165_s0 = scalar_lea.vmem %s103_s12, 128  ;;  %p170_p3 = scmp.lt.s32.totalorder %s103_s12, %s103_s12 }
  0x29   :  { %p166_p2 = scmp.ne.s32.totalorder %s103_s12, %s165_s0  ;;  %p171_p4 = scmp.lt.s32.totalorder %s165_s0, %s165_s0 }
  0x2a   :  { %v68_v7 = vmul.f32 %v66_v4, %v66_v4  ;;  %v69_v8 = vmul.f32 %v67_v5, %v67_v5 }
  0x2b   :  { %p172_p5 = por %p171_p4, %p170_p3 }
  0x2c   :  { %v71_v9 = vadd.f32 %v70_v6, %v68_v7  ;;  %v72_v10 = vadd.f32 %v70_v6, %v69_v8 }
  0x2d   :  { %p173_p6 = pnand %p172_p5, %p166_p2 }
  0x2e   :  { %117 = vrsqrt.f32 %v71_v9  ;;  %vm75_vm0 = vcmp.eq.f32.partialorder %v71_v9, inf  ;;  %v78_v12 = vand.u32 2147483648, %v71_v9  ;;  %vm77_vm1 = vcmp.eq.f32.partialorder %v71_v9, 0.0 }
  0x2f   :  { %119 = vrsqrt.f32 %v72_v10  ;;  %vm82_vm2 = vcmp.eq.f32.partialorder %v72_v10, inf  ;;  %v85_v15 = vand.u32 2147483648, %v72_v10  ;;  %vm84_vm3 = vcmp.eq.f32.partialorder %v72_v10, 0.0 }
  0x38   :  { %v118_v11 = vpop.eup %117 }
  0x39   :  { %v120_v13 = vpop.eup %119  ;;  %v74_v14 = vmul.f32 %v118_v11, %v71_v9 }
  0x3a   :  { %v81_v16 = vmul.f32 %v120_v13, %v72_v10 }
  0x3b   :  { %v76_v17 = vsel %vm75_vm0, %v71_v9, %v74_v14 }
  0x3c   :  { %v79_v18 = vsel %vm77_vm1, %v78_v12, %v76_v17  ;;  %v83_v19 = vsel %vm82_vm2, %v72_v10, %v81_v16 }
  0x3d   :  { %v86_v20 = vsel %vm84_vm3, %v85_v15, %v83_v19 }
  0x3e   :  { %v88_v21 = vadd.f32 %v86_v20, %v79_v18 }
  0x40   :  { %95 = vst [vmem:[#allocation9] sm:$0xff] %v88_v21 }
  0x41   :  { %176 = shalt.err (!%p173_p6)
}
  0x42   :  { %s177_s15 = scalar_lea.hbm %s260_s3, 128 }
  0x43   :  { %p178_p7 = scmp.ne.s32.totalorder %s260_s3, %s177_s15  ;;  %p181_p8 = scmp.lt.u32.totalorder %s177_s15, %s260_s3 }
  0x45   :  { %p183_p9 = pnand %p181_p8, %p178_p7 }
  0x47   :  { %186 = shalt.err (!%p183_p9)
}
  0x48   :  { %105 = dma.vmem_to_hbm [thread:$0]  %s103_s12, 128, %s260_s3, [#allocation6]  }
  0x49   :  { %191 = dma.done.wait [#allocation6], 128  }
  0x4a   :  { %192 = vsyncadd [#allocation6], 4294967168 }
  0x4b   :  { %109 = vsyncpa [#allocation5], 1 }
  0x4c   :  { %110 = vsyncpa [#allocation8], 1 }
  0x4d   :  { %111 = vsyncpa [#allocation6], 1 }

</bundles_post_ra>
